<compile_context>
chip_gen: v7x
topology: tpu7x:2x2x1
jax: 0.10.0
libtpu: 0.0.40
codegen_flags: <defaults>
</compile_context>

<pallas_src>
import functools

import jax
import jax.numpy as jnp
from jax import lax
from jax.experimental import pallas as pl
from jax.experimental.pallas import tpu as pltpu

_LANES = 128
# (2048, 128) f32 tile = 1 MiB per operand per pipeline buffer.
_MAX_BLOCK_ROWS = 2048


def _smooth_l1(x, y):
    d = x - y
    ad = jnp.abs(d)
    return jnp.where(ad < 1.0, 0.5 * d * d, ad - 0.5)


def _choose_block_rows(rows):
    # Either one block equal to the full array dim (always a legal BlockSpec),
    # or a large multiple-of-8 block with a (masked) partial last block.
    if rows <= _MAX_BLOCK_ROWS:
        return rows
    return _MAX_BLOCK_ROWS


def _sum_partials_kernel(x_ref, y_ref, o_ref, *, rows, block_rows, mask_tail):
    """Per-block partial sums: writes an (8, 128) f32 partial per grid step."""
    loss = _smooth_l1(x_ref[...].astype(jnp.float32),
                      y_ref[...].astype(jnp.float32))
    if mask_tail:
        # Only needed when rows % block_rows != 0 (partial last block): the
        # out-of-range region of the input block holds unspecified data.
        row = (pl.program_id(0) * block_rows
               + lax.broadcasted_iota(jnp.int32, loss.shape, 0))
        loss = jnp.where(row < rows, loss, 0.0)

    if block_rows % 8 == 0:
        # Reduce (BR, 128) -> (8, 128) with pure VPU vreg adds (no XLU).
        part = loss.reshape(block_rows // 8, 8, _LANES).sum(axis=0)
    else:
        # Tiny single-block case (rows < _MAX_BLOCK_ROWS and not a multiple of
        # 8): one cross-sublane reduce is negligible here.
        sub = lax.broadcasted_iota(jnp.int32, (8, _LANES), 0)
        part = jnp.where(sub == 0, jnp.sum(loss, axis=0, keepdims=True), 0.0)

    o_ref[...] = part.reshape(1, 8, _LANES)


def _none_kernel(x_ref, y_ref, o_ref):
    loss = _smooth_l1(x_ref[...].astype(jnp.float32),
                      y_ref[...].astype(jnp.float32))
    o_ref[...] = loss.astype(o_ref.dtype)


def smooth_l1_loss(inputs, targets, reduction: str = "sum", eps: float = 1e-08):
    """Pallas TPU implementation of SmoothL1Loss.forward.

    `eps` is accepted for API parity with the PyTorch module (which also never
    uses it in forward).
    """
    assert inputs.shape == targets.shape, "inputs/targets must have identical shapes"
    del eps  # unused, exactly like the reference module
    out_dtype = jnp.result_type(inputs.dtype, targets.dtype)
    numel = inputs.size

    if numel == 0:
        if reduction == "none":
            return jnp.zeros(inputs.shape, out_dtype)
        # Matches `loss.sum()` / `0.0 * loss.sum()` on an empty tensor.
        return jnp.zeros((), out_dtype)

    x_flat = jnp.ravel(inputs)
    y_flat = jnp.ravel(targets)

    if reduction == "none":
        n = numel
        n_pad = (-n) % _LANES
        if n_pad:
            # Rare unaligned case: pad only to a lane multiple (single copy).
            x_flat = jnp.concatenate([x_flat, jnp.zeros((n_pad,), x_flat.dtype)])
            y_flat = jnp.concatenate([y_flat, jnp.zeros((n_pad,), y_flat.dtype)])
        rows = (n + n_pad) // _LANES
        block_rows = _choose_block_rows(rows)
        x2d = x_flat.reshape(rows, _LANES)
        y2d = y_flat.reshape(rows, _LANES)
        out2d = pl.pallas_call(
            _none_kernel,
            out_shape=jax.ShapeDtypeStruct((rows, _LANES), out_dtype),
            grid_spec=pltpu.PrefetchScalarGridSpec(
                num_scalar_prefetch=0,
                grid=(pl.cdiv(rows, block_rows),),
                in_specs=[
                    pl.BlockSpec((block_rows, _LANES), lambda i: (i, 0)),
                    pl.BlockSpec((block_rows, _LANES), lambda i: (i, 0)),
                ],
                out_specs=pl.BlockSpec((block_rows, _LANES), lambda i: (i, 0)),
            ),
            compiler_params=pltpu.CompilerParams(
                dimension_semantics=("parallel",)),
        )(x2d, y2d)
        return out2d.reshape(-1)[:n].reshape(inputs.shape)

    # ---- reduction == "sum" or "mean": parallel two-stage reduction ----
    rows = numel // _LANES
    n_main = rows * _LANES
    tail = numel - n_main

    total = jnp.zeros((), jnp.float32)
    if rows > 0:
        block_rows = _choose_block_rows(rows)
        num_blocks = pl.cdiv(rows, block_rows)
        mask_tail = (rows % block_rows) != 0
        # Full-extent slice + reshape: no copy when numel is lane-aligned.
        x2d = x_flat[:n_main].reshape(rows, _LANES)
        y2d = y_flat[:n_main].reshape(rows, _LANES)
        kernel = functools.partial(
            _sum_partials_kernel,
            rows=rows, block_rows=block_rows, mask_tail=mask_tail)
        partials = pl.pallas_call(
            kernel,
            out_shape=jax.ShapeDtypeStruct((num_blocks, 8, _LANES), jnp.float32),
            grid_spec=pltpu.PrefetchScalarGridSpec(
                num_scalar_prefetch=0,
                grid=(num_blocks,),
                in_specs=[
                    pl.BlockSpec((block_rows, _LANES), lambda i: (i, 0)),
                    pl.BlockSpec((block_rows, _LANES), lambda i: (i, 0)),
                ],
                out_specs=pl.BlockSpec((1, 8, _LANES), lambda i: (i, 0, 0)),
            ),
            compiler_params=pltpu.CompilerParams(
                dimension_semantics=("parallel",)),
        )(x2d, y2d)
        total = jnp.sum(partials)

    if tail:
        # <=127 leftover elements: negligible, done in plain JAX (avoids a
        # full-array pad/concatenate copy just for the scalar reduction).
        total = total + jnp.sum(
            _smooth_l1(x_flat[n_main:].astype(jnp.float32),
                       y_flat[n_main:].astype(jnp.float32)))

    if reduction == "mean":
        total = total / jnp.float32(numel)
    return total.astype(out_dtype)


def _reference(inputs, targets, reduction="sum"):
    d = inputs.astype(jnp.float32) - targets.astype(jnp.float32)
    ad = jnp.abs(d)
    loss = jnp.where(ad < 1.0, 0.5 * d * d, ad - 0.5)
    if reduction == "mean":
        return loss.mean()
    if reduction == "sum":
        return loss.sum()
    return loss


if __name__ == "__main__":
    key = jax.random.PRNGKey(0)
    k1, k2, k3, k4 = jax.random.split(key, 4)

    # NCHW-like shape as in typical detection losses (lane-aligned case).
    shape = (2, 4, 16, 16)
    inputs = jax.random.normal(k1, shape, dtype=jnp.float32) * 2.0
    targets = jax.random.normal(k2, shape, dtype=jnp.float32) * 2.0

    out_sum = jax.block_until_ready(smooth_l1_loss(inputs, targets, reduction="sum"))
    out_mean = jax.block_until_ready(smooth_l1_loss(inputs, targets, reduction="mean"))
    out_none = jax.block_until_ready(smooth_l1_loss(inputs, targets, reduction="none"))

    assert jnp.allclose(out_sum, _reference(inputs, targets, "sum"), rtol=1e-5, atol=1e-5)
    assert jnp.allclose(out_mean, _reference(inputs, targets, "mean"), rtol=1e-5, atol=1e-5)
    assert jnp.allclose(out_none, _reference(inputs, targets, "none"), rtol=1e-5, atol=1e-5)
    assert out_none.shape == shape and out_none.dtype == inputs.dtype

    # Unaligned shape: exercises the in-kernel row handling + lane-tail path.
    shape2 = (5, 300)  # 1500 elements: rows=11, lane tail=92
    a = jax.random.normal(k3, shape2, dtype=jnp.float32) * 2.0
    b = jax.random.normal(k4, shape2, dtype=jnp.float32) * 2.0
    s2 = jax.block_until_ready(smooth_l1_loss(a, b, reduction="sum"))
    m2 = jax.block_until_ready(smooth_l1_loss(a, b, reduction="mean"))
    n2 = jax.block_until_ready(smooth_l1_loss(a, b, reduction="none"))
    assert jnp.allclose(s2, _reference(a, b, "sum"), rtol=1e-5, atol=1e-5)
    assert jnp.allclose(m2, _reference(a, b, "mean"), rtol=1e-5, atol=1e-5)
    assert jnp.allclose(n2, _reference(a, b, "none"), rtol=1e-5, atol=1e-5)

    print("KERNEL_OK")
</pallas_src>

<mosaic_0001>
module attributes {stable_mosaic.version = 11 : i64} {
  func.func @_sum_partials_kernel(%arg0: i32, %arg1: memref<16x128xf32, #tpu.memory_space<vmem>>, %arg2: memref<16x128xf32, #tpu.memory_space<vmem>>, %arg3: memref<1x8x128xf32, #tpu.memory_space<vmem>>) attributes {dimension_semantics = [#tpu.dimension_semantics<parallel>], iteration_bounds = array<i64: 1>, scalar_prefetch = 0 : i64, scratch_operands = 0 : i64, tpu.core_type = #tpu.core_type<tc>, window_params = [{transform_indices = @transform_0, window_bounds = array<i64: 16, 128>}, {transform_indices = @transform_1, window_bounds = array<i64: 16, 128>}, {transform_indices = @transform_2, window_bounds = array<i64: 1, 8, 128>}]} {
    %c0 = arith.constant 0 : index
    %c0_0 = arith.constant 0 : index
    %0 = vector.load %arg1[%c0, %c0_0] : memref<16x128xf32, #tpu.memory_space<vmem>>, vector<16x128xf32>
    %c0_1 = arith.constant 0 : index
    %c0_2 = arith.constant 0 : index
    %1 = vector.load %arg2[%c0_1, %c0_2] : memref<16x128xf32, #tpu.memory_space<vmem>>, vector<16x128xf32>
    %2 = arith.subf %0, %1 : vector<16x128xf32>
    %3 = math.absf %2 : vector<16x128xf32>
    %cst = arith.constant 1.000000e+00 : f32
    %4 = vector.broadcast %cst : f32 to vector<16x128xf32>
    %5 = arith.cmpf olt, %3, %4 : vector<16x128xf32>
    %cst_3 = arith.constant 5.000000e-01 : f32
    %6 = vector.broadcast %cst_3 : f32 to vector<16x128xf32>
    %7 = arith.mulf %6, %2 : vector<16x128xf32>
    %8 = arith.mulf %7, %2 : vector<16x128xf32>
    %cst_4 = arith.constant 5.000000e-01 : f32
    %9 = vector.broadcast %cst_4 : f32 to vector<16x128xf32>
    %10 = arith.subf %3, %9 : vector<16x128xf32>
    %11 = arith.select %5, %8, %10 : vector<16x128xi1>, vector<16x128xf32>
    %12 = vector.shape_cast %11 : vector<16x128xf32> to vector<2x8x128xf32>
    %cst_5 = arith.constant dense<0.000000e+00> : vector<8x128xf32>
    %13 = vector.multi_reduction <add>, %12, %cst_5 [0] : vector<2x8x128xf32> to vector<8x128xf32>
    %14 = vector.shape_cast %13 : vector<8x128xf32> to vector<1x8x128xf32>
    %c0_6 = arith.constant 0 : index
    %c0_7 = arith.constant 0 : index
    %c0_8 = arith.constant 0 : index
    %15 = vector.load %arg3[%c0_6, %c0_7, %c0_8] : memref<1x8x128xf32, #tpu.memory_space<vmem>>, vector<1x8x128xf32>
    tpu.vector_store %arg3[%c0_6, %c0_7, %c0_8], %14 {strides = array<i32>} : memref<1x8x128xf32, #tpu.memory_space<vmem>>, vector<1x8x128xf32>,
    return
  }
  func.func @transform_0(%arg0: i32) -> (i32, i32) {
    %c0_i32 = arith.constant 0 : i32
    %c0_i32_0 = arith.constant 0 : i32
    return %arg0, %c0_i32 : i32, i32
  }
  func.func @transform_1(%arg0: i32) -> (i32, i32) {
    %c0_i32 = arith.constant 0 : i32
    %c0_i32_0 = arith.constant 0 : i32
    return %arg0, %c0_i32 : i32, i32
  }
  func.func @transform_2(%arg0: i32) -> (i32, i32, i32) {
    %c0_i32 = arith.constant 0 : i32
    %c0_i32_0 = arith.constant 0 : i32
    %c0_i32_1 = arith.constant 0 : i32
    return %arg0, %c0_i32, %c0_i32_0 : i32, i32, i32
  }
}

</mosaic_0001>

<bundles_post_ra>
// kernel: tpu_custom_call.1
= control target key start
LH: loop header
LB: loop body
LE: loop exit
PB: predicated region body
PF: predicated region fallthrough
CT: control target
= control target key end

     0   :  { %7 = vsyncpa [#allocation3], 0  ;;  %s211_s0 = inlined_call_operand.hbm [shape: f32[16,128], index: 0, kind: input, shape index: {}]   ;;  %s212_s1 = inlined_call_operand.hbm [shape: f32[16,128], index: 1, kind: input, shape index: {}]   ;;  %s213_s2 = inlined_call_operand.hbm [shape: f32[1,8,128], index: 2, kind: output, shape index: {}]  }
   0x1   :  { %8 = vsyncpa [#allocation6], 0 }
   0x2   :  { %9 = vsyncpa [#allocation4], 0  ;;  %s155_s9 = smov [#allocation2]   ;;  %s83_s13 = scalar_lea.hbm %s211_s0, 256 }
   0x3   :  { %s15_s10 = sshll.u32 %s155_s9, 4  ;;  %p84_p0 = scmp.ne.s32.totalorder %s211_s0, %s83_s13  ;;  %s16_s10 = int_to_ptr.vmem [resolvable:$true] %s15_s10 }
   0x4   :  { %p87_p1 = scmp.lt.u32.totalorder %s83_s13, %s211_s0 }
   0x6   :  { %p89_p2 = pnand %p87_p1, %p84_p0 }
   0x8   :  { %92 = shalt.err (!%p89_p2)
}
   0x9   :  { %s93_s18 = scalar_lea.vmem %s16_s10, 256  ;;  %p98_p4 = scmp.lt.s32.totalorder %s16_s10, %s16_s10 }
   0xa   :  { %p94_p3 = scmp.ne.s32.totalorder %s16_s10, %s93_s18  ;;  %p99_p5 = scmp.lt.s32.totalorder %s93_s18, %s93_s18 }
   0xc   :  { %p100_p6 = por %p99_p5, %p98_p4 }
   0xe   :  { %p101_p7 = pnand %p100_p6, %p94_p3 }
  0x10   :  { %104 = shalt.err (!%p101_p7)
}
  0x11   :  { %s156_s19 = smov 128   ;;  %s157_s20 = smov 8  }
  0x12   :  { %21 = dma.hbm_to_vmem [thread:$0]  %s211_s0, 256, %s16_s10, [#allocation3], %s156_s19, %s156_s19, %s157_s20  }
  0x13   :  { %s158_s23 = smov [#allocation5]   ;;  %s105_s27 = scalar_lea.hbm %s212_s1, 256 }
  0x14   :  { %s27_s24 = sshll.u32 %s158_s23, 4  ;;  %p106_p8 = scmp.ne.s32.totalorder %s212_s1, %s105_s27  ;;  %s28_s24 = int_to_ptr.vmem [resolvable:$true] %s27_s24 }
  0x15   :  { %p109_p9 = scmp.lt.u32.totalorder %s105_s27, %s212_s1 }
  0x17   :  { %p111_p10 = pnand %p109_p9, %p106_p8 }
  0x19   :  { %114 = shalt.err (!%p111_p10)
}
  0x1a   :  { %s115_s4 = scalar_lea.vmem %s28_s24, 256  ;;  %p120_p12 = scmp.lt.s32.totalorder %s28_s24, %s28_s24 }
  0x1b   :  { %p116_p11 = scmp.ne.s32.totalorder %s28_s24, %s115_s4  ;;  %p121_p13 = scmp.lt.s32.totalorder %s115_s4, %s115_s4 }
  0x1d   :  { %p122_p0 = por %p121_p13, %p120_p12 }
  0x1f   :  { %p123_p1 = pnand %p122_p0, %p116_p11 }
  0x21   :  { %126 = shalt.err (!%p123_p1)
}
  0x22   :  { %33 = dma.hbm_to_vmem [thread:$0]  %s212_s1, 256, %s28_s24, [#allocation6], %s156_s19, %s156_s19, %s157_s20  }
  0x23   :  { %149 = dma.done.wait [#allocation3], 256  }
  0x24   :  { %150 = vsyncadd [#allocation3], 4294967040 }
  0x25   :  { %151 = dma.done.wait [#allocation6], 256  }
  0x26   :  { %152 = vsyncadd [#allocation6], 4294967040  ;;  %v40_v0 = vld [vmem:[#allocation2] sm:$0xff]  ;;  %v41_v1 = vld [vmem:[#allocation2 + $0x8] sm:$0xff]  ;;  %s159_s1 = smov [#allocation7]  }
  0x27   :  { %v42_v2 = vld [vmem:[#allocation5] sm:$0xff]  ;;  %v43_v3 = vld [vmem:[#allocation5 + $0x8] sm:$0xff]  ;;  %s66_s6 = sshll.u32 %s159_s1, 4  ;;  %s67_s6 = int_to_ptr.vmem [resolvable:$true] %s66_s6 }
  0x28   :  { %v44_v4 = vsub.f32 %v40_v0, %v42_v2  ;;  %v45_v5 = vsub.f32 %v41_v1, %v43_v3  ;;  %s127_s7 = scalar_lea.vmem %s67_s6, 128  ;;  %p132_p3 = scmp.lt.s32.totalorder %s67_s6, %s67_s6 }
  0x29   :  { %p128_p2 = scmp.ne.s32.totalorder %s67_s6, %s127_s7  ;;  %p133_p4 = scmp.lt.s32.totalorder %s127_s7, %s127_s7 }
  0x2a   :  { %v46_v6 = vand.u32 2147483647, %v44_v4  ;;  %v50_v7 = vmul.f32 0.5, %v44_v4  ;;  %v47_v8 = vand.u32 2147483647, %v45_v5  ;;  %v51_v9 = vmul.f32 0.5, %v45_v5 }
  0x2b   :  { %p134_p5 = por %p133_p4, %p132_p3 }
  0x2c   :  { %vm48_vm0 = vcmp.lt.f32.partialorder %v46_v6, 1.0  ;;  %v52_v10 = vmul.f32 %v50_v7, %v44_v4  ;;  %v76_v11 = vadd.f32 -0.5, %v46_v6  ;;  %vm49_vm1 = vcmp.lt.f32.partialorder %v47_v8, 1.0 }
  0x2d   :  { %v53_v12 = vmul.f32 %v51_v9, %v45_v5  ;;  %v77_v13 = vadd.f32 -0.5, %v47_v8  ;;  %p135_p6 = pnand %p134_p5, %p128_p2 }
  0x2e   :  { %v56_v14 = vsel %vm48_vm0, %v52_v10, %v76_v11 }
  0x2f   :  { %v57_v15 = vsel %vm49_vm1, %v53_v12, %v77_v13 }
  0x30   :  { %v58_v16 = vadd.f32 %v57_v15, %v56_v14 }
  0x32   :  { %59 = vst [vmem:[#allocation7] sm:$0xff] %v58_v16 }
  0x33   :  { %138 = shalt.err (!%p135_p6)
}
  0x34   :  { %s139_s10 = scalar_lea.hbm %s213_s2, 128 }
  0x35   :  { %p140_p7 = scmp.ne.s32.totalorder %s213_s2, %s139_s10  ;;  %p143_p8 = scmp.lt.u32.totalorder %s139_s10, %s213_s2 }
  0x37   :  { %p145_p9 = pnand %p143_p8, %p140_p7 }
  0x39   :  { %148 = shalt.err (!%p145_p9)
}
  0x3a   :  { %69 = dma.vmem_to_hbm [thread:$0]  %s67_s6, 128, %s213_s2, [#allocation4]  }
  0x3b   :  { %153 = dma.done.wait [#allocation4], 128  }
  0x3c   :  { %154 = vsyncadd [#allocation4], 4294967168 }
  0x3d   :  { %73 = vsyncpa [#allocation3], 1 }
  0x3e   :  { %74 = vsyncpa [#allocation6], 1 }
  0x3f   :  { %75 = vsyncpa [#allocation4], 1 }

</bundles_post_ra>
